<compile_context>
chip_gen: v5e
topology: v5e:2x2
jax: 0.10.0
libtpu: 0.0.40
codegen_flags: <defaults>
</compile_context>

<pallas_src>
import functools

import jax
import jax.numpy as jnp
from jax.experimental import pallas as pl
from jax.experimental.pallas import tpu as pltpu

LANE = 128  # vreg lane width (f32/bf16)


def _round_up(v, m):
    return (v + m - 1) // m * m


def _pick_tile(n_p, prefs=(512, 256, 128)):
    """Largest preferred tile that divides n_p (n_p is always a multiple of 128)."""
    for t in prefs:
        if n_p % t == 0:
            return t
    return n_p


# ----------------------------------------------------------------------------
# Phase A: feature transform  t = x @ W   (row-block parallel grid)
# ----------------------------------------------------------------------------
def _feature_transform_kernel(x_ref, w_ref, o_ref):
    # bf16 operands cast in-kernel (hidden under the MXU), f32 accumulation.
    x = x_ref[...].astype(jnp.bfloat16)
    w = w_ref[...].astype(jnp.bfloat16)
    o_ref[...] = jnp.dot(x, w, preferred_element_type=jnp.float32).astype(o_ref.dtype)


def _feature_transform(x_p, w_p, *, tm):
    n_p, f_p = x_p.shape
    h_p = w_p.shape[1]
    return pl.pallas_call(
        _feature_transform_kernel,
        out_shape=jax.ShapeDtypeStruct((n_p, h_p), jnp.bfloat16),
        grid=(n_p // tm,),
        in_specs=[
            pl.BlockSpec((tm, f_p), lambda i: (i, 0)),
            pl.BlockSpec((f_p, h_p), lambda i: (0, 0)),
        ],
        out_specs=pl.BlockSpec((tm, h_p), lambda i: (i, 0)),
        compiler_params=pltpu.CompilerParams(dimension_semantics=("parallel",)),
        cost_estimate=pl.CostEstimate(
            flops=2 * n_p * f_p * h_p,
            transcendentals=0,
            bytes_accessed=x_p.size * x_p.dtype.itemsize
            + w_p.size * w_p.dtype.itemsize
            + n_p * h_p * 2,
        ),
    )(x_p, w_p)


# ----------------------------------------------------------------------------
# Phase B: adjacency streaming  out = act(adj @ t)
#   grid = (row blocks [parallel], contraction blocks [arbitrary, trailing])
#   f32 VMEM accumulator, pl.when init at k==0, act + store at k==last.
# ----------------------------------------------------------------------------
def _adj_matmul_kernel(adj_ref, t_ref, o_ref, acc_ref, *, apply_relu):
    k = pl.program_id(1)

    @pl.when(k == 0)
    def _():
        acc_ref[...] = jnp.zeros_like(acc_ref)

    adj = adj_ref[...].astype(jnp.bfloat16)  # in-kernel bf16 cast of the f32 adj block
    t = t_ref[...].astype(jnp.bfloat16)
    acc_ref[...] += jnp.dot(adj, t, preferred_element_type=jnp.float32)

    @pl.when(k == pl.num_programs(1) - 1)
    def _():
        acc = acc_ref[...]
        if apply_relu:
            acc = jnp.maximum(acc, 0.0)
        o_ref[...] = acc.astype(o_ref.dtype)


def _adj_matmul(adj_p, t, *, tm, tk, apply_relu, out_dtype):
    n_p = adj_p.shape[0]
    h_p = t.shape[1]
    kernel = functools.partial(_adj_matmul_kernel, apply_relu=apply_relu)
    return pl.pallas_call(
        kernel,
        out_shape=jax.ShapeDtypeStruct((n_p, h_p), out_dtype),
        grid=(n_p // tm, n_p // tk),
        in_specs=[
            pl.BlockSpec((tm, tk), lambda i, k: (i, k)),
            pl.BlockSpec((tk, h_p), lambda i, k: (k, 0)),
        ],
        out_specs=pl.BlockSpec((tm, h_p), lambda i, k: (i, 0)),
        scratch_shapes=[pltpu.VMEM((tm, h_p), jnp.float32)],
        compiler_params=pltpu.CompilerParams(
            dimension_semantics=("parallel", "arbitrary")
        ),
        cost_estimate=pl.CostEstimate(
            flops=2 * n_p * n_p * h_p,
            transcendentals=0,
            bytes_accessed=adj_p.size * adj_p.dtype.itemsize
            + t.size * t.dtype.itemsize
            + n_p * h_p * jnp.dtype(out_dtype).itemsize,
        ),
    )(adj_p, t)


# ----------------------------------------------------------------------------
# Forward: GCNModelAE.forward(x, adj) -> (z, z, None)
# ----------------------------------------------------------------------------
def gcn_model_ae_forward(x, adj, w1, w2):
    """x: [N, F_in] f32, adj: [N, N] f32 (normalized dense adjacency),
    w1: [F_in, H1], w2: [H1, H2]."""
    # TODO(synk): dropout treated as identity (eval mode); training-mode dropout
    # would need pltpu.prng_seed / prng_random_bits masking inside the kernels.
    n, f_in = x.shape
    h1_dim = w1.shape[1]
    h2_dim = w2.shape[1]

    # Lane-dense zero padding: N padded to 128 so adj is lane-dense (review item #1).
    n_p = _round_up(n, LANE)
    f_p = _round_up(f_in, LANE)
    h1_p = _round_up(h1_dim, LANE)
    h2_p = _round_up(h2_dim, LANE)

    # Single jnp.pad per operand; no separate wrapper-side bf16 cast of adj.
    x_p = jnp.pad(x.astype(jnp.float32), ((0, n_p - n), (0, f_p - f_in)))
    adj_p = jnp.pad(adj.astype(jnp.float32), ((0, n_p - n), (0, n_p - n)))
    w1_p = jnp.pad(w1.astype(jnp.float32), ((0, f_p - f_in), (0, h1_p - h1_dim)))
    w2_p = jnp.pad(w2.astype(jnp.float32), ((0, h1_p - h1_dim), (0, h2_p - h2_dim)))

    tm = _pick_tile(n_p)  # adj row-block (parallel axis)
    tk = _pick_tile(n_p)  # adj contraction block (trailing, arbitrary)

    # gc1: hidden1 = relu(adj @ (x @ W1))
    xw1 = _feature_transform(x_p, w1_p, tm=tm)                       # [n_p, h1_p] bf16
    h1 = _adj_matmul(adj_p, xw1, tm=tm, tk=tk,
                     apply_relu=True, out_dtype=jnp.bfloat16)         # [n_p, h1_p]

    # gc2: z = adj @ (hidden1 @ W2)
    t2 = _feature_transform(h1, w2_p, tm=tm)                          # [n_p, h2_p] bf16
    z_p = _adj_matmul(adj_p, t2, tm=tm, tk=tk,
                      apply_relu=False, out_dtype=jnp.float32)        # [n_p, h2_p] f32

    z = z_p[:n, :h2_dim]
    return z, z, None


def _glorot(key, shape):
    fan_in, fan_out = shape
    limit = jnp.sqrt(6.0 / (fan_in + fan_out))
    return jax.random.uniform(key, shape, jnp.float32, -limit, limit)


if __name__ == "__main__":
    # Small shapes: N=32 nodes, input_feat_dim=16, hidden_dim1=32, hidden_dim2=16.
    N, F_IN, H1, H2 = 32, 16, 32, 16

    key = jax.random.PRNGKey(0)
    k_x, k_adj, k_w1, k_w2 = jax.random.split(key, 4)

    x = jax.random.normal(k_x, (N, F_IN), jnp.float32)

    # Symmetric, self-looped, row-normalized dense adjacency (typical GAE preprocessing).
    a = (jax.random.uniform(k_adj, (N, N)) > 0.8).astype(jnp.float32)
    a = jnp.maximum(a, a.T) + jnp.eye(N, dtype=jnp.float32)
    adj = a / jnp.sum(a, axis=1, keepdims=True)

    w1 = _glorot(k_w1, (F_IN, H1))
    w2 = _glorot(k_w2, (H1, H2))

    z, z2, none_out = gcn_model_ae_forward(x, adj, w1, w2)
    jax.block_until_ready(z)

    # Pure-JAX f32 reference (bf16 operands in-kernel -> loosened tolerance).
    ref_h1 = jnp.maximum(adj @ (x @ w1), 0.0)
    ref_z = adj @ (ref_h1 @ w2)
    assert z.shape == (N, H2)
    assert none_out is None
    assert jnp.allclose(z, ref_z, atol=5e-2, rtol=5e-2), float(jnp.max(jnp.abs(z - ref_z)))
    assert jnp.allclose(z, z2)

    print("KERNEL_OK")
</pallas_src>

<mosaic_0001>
module attributes {stable_mosaic.version = 11 : i64} {
  func.func @_feature_transform_kernel(%arg0: i32, %arg1: memref<128x128xf32, #tpu.memory_space<vmem>>, %arg2: memref<128x128xf32, #tpu.memory_space<vmem>>, %arg3: memref<128x128xbf16, #tpu.memory_space<vmem>>) attributes {dimension_semantics = [#tpu.dimension_semantics<parallel>], iteration_bounds = array<i64: 1>, scalar_prefetch = 0 : i64, scratch_operands = 0 : i64, tpu.core_type = #tpu.core_type<tc>, window_params = [{transform_indices = @transform_0, window_bounds = array<i64: 128, 128>}, {pipeline_mode = #tpu.pipeline_mode<synchronous>, transform_indices = @transform_1, window_bounds = array<i64: 128, 128>}, {transform_indices = @transform_2, window_bounds = array<i64: 128, 128>}]} {
    %c0 = arith.constant 0 : index
    %c0_0 = arith.constant 0 : index
    %0 = vector.load %arg1[%c0, %c0_0] : memref<128x128xf32, #tpu.memory_space<vmem>>, vector<128x128xf32>
    %1 = arith.truncf %0 : vector<128x128xf32> to vector<128x128xbf16>
    %c0_1 = arith.constant 0 : index
    %c0_2 = arith.constant 0 : index
    %2 = vector.load %arg2[%c0_1, %c0_2] : memref<128x128xf32, #tpu.memory_space<vmem>>, vector<128x128xf32>
    %3 = arith.truncf %2 : vector<128x128xf32> to vector<128x128xbf16>
    %cst = arith.constant dense<0.000000e+00> : vector<128x128xf32>
    %4 = tpu.matmul %1, %3, %cst {dimension_numbers = #tpu.dot_dimension_numbers<[1], [0], [0], [1], [0, 0, 1, 1], [], []>} : vector<128x128xbf16>, vector<128x128xbf16>, vector<128x128xf32> -> vector<128x128xf32>
    %5 = arith.truncf %4 : vector<128x128xf32> to vector<128x128xbf16>
    %c0_3 = arith.constant 0 : index
    %c0_4 = arith.constant 0 : index
    %6 = vector.load %arg3[%c0_3, %c0_4] : memref<128x128xbf16, #tpu.memory_space<vmem>>, vector<128x128xbf16>
    tpu.vector_store %arg3[%c0_3, %c0_4], %5 {strides = array<i32>} : memref<128x128xbf16, #tpu.memory_space<vmem>>, vector<128x128xbf16>,
    return
  }
  func.func @transform_0(%arg0: i32) -> (i32, i32) {
    %c0_i32 = arith.constant 0 : i32
    %c0_i32_0 = arith.constant 0 : i32
    return %arg0, %c0_i32 : i32, i32
  }
  func.func @transform_1(%arg0: i32) -> (i32, i32) {
    %c0_i32 = arith.constant 0 : i32
    %c0_i32_0 = arith.constant 0 : i32
    %c0_i32_1 = arith.constant 0 : i32
    return %c0_i32, %c0_i32_0 : i32, i32
  }
  func.func @transform_2(%arg0: i32) -> (i32, i32) {
    %c0_i32 = arith.constant 0 : i32
    %c0_i32_0 = arith.constant 0 : i32
    return %arg0, %c0_i32 : i32, i32
  }
}

</mosaic_0001>

<bundles_post_ra>
// kernel: tpu_custom_call.1
= control target key start
LH: loop header
LB: loop body
LE: loop exit
PB: predicated region body
PF: predicated region fallthrough
CT: control target
= control target key end

     0   :  { %7 = vsyncpa [#allocation3], 0  ;;  %s380_s0 = inlined_call_operand.hbm [shape: f32[128,128], index: 0, kind: input, shape index: {}]   ;;  %s381_s1 = inlined_call_operand.hbm [shape: f32[128,128], index: 1, kind: input, shape index: {}]   ;;  %s382_s2 = inlined_call_operand.hbm [shape: bf16[128,128], index: 2, kind: output, shape index: {}]  }
   0x1   :  { %8 = vsyncpa [#allocation6], 0 }
   0x2   :  { %9 = vsyncpa [#allocation4], 0  ;;  %s14_s11 = sshll.u32 %s380_s0, 4  ;;  %s349_s12 = smov [#allocation2]   ;;  %s15_s11 = int_to_ptr.hbm [resolvable:$true] %s14_s11 }
   0x3   :  { %s16_s13 = sshll.u32 %s349_s12, 4  ;;  %s27_s16 = sshll.u32 %s381_s1, 4  ;;  %s17_s13 = int_to_ptr.vmem [resolvable:$true] %s16_s13  ;;  %s28_s16 = int_to_ptr.hbm [resolvable:$true] %s27_s16 }
   0x4   :  { %s350_s17 = smov 128   ;;  %s351_s18 = smov 8  }
   0x5   :  { %22 = dma.hbm_to_vmem [thread:$0]  %s15_s11, 2048, %s17_s13, [#allocation3], %s350_s17, %s350_s17, %s351_s18  }
   0x6   :  { %s352_s19 = smov [#allocation5]  }
   0x7   :  { %s29_s20 = sshll.u32 %s352_s19, 4  ;;  %s30_s20 = int_to_ptr.vmem [resolvable:$true] %s29_s20 }
   0x8   :  { %35 = dma.hbm_to_vmem [thread:$0]  %s28_s16, 2048, %s30_s20, [#allocation6], %s350_s17, %s350_s17, %s351_s18  }
   0x9   :  { %343 = dma.done.wait [#allocation3], 2048  }
   0xa   :  { %344 = vsyncadd [#allocation3], 4294965248 }
   0xb   :  { %345 = dma.done.wait [#allocation6], 2048  }
   0xc   :  { %346 = vsyncadd [#allocation6], 4294965248  ;;  %v82_v0 = vld [vmem:[#allocation5 + $0x70] sm:$0xff]  ;;  %v83_v1 = vld [vmem:[#allocation5 + $0x78] sm:$0xff]  ;;  %s353_s0 = smov [#allocation7]   ;;  %s179_s23 = sshll.u32 %s382_s2, 4  ;;  %s180_s23 = int_to_ptr.hbm [resolvable:$true] %s179_s23 }
   0xd   :  { %v80_v2 = vld [vmem:[#allocation5 + $0x60] sm:$0xff]  ;;  %v91_v3 = vpack.c.bf16 %v83_v1, %v82_v0  ;;  %v81_v4 = vld [vmem:[#allocation5 + $0x68] sm:$0xff]  ;;  %v78_v6 = vld [vmem:[#allocation5 + $0x50] sm:$0xff]  ;;  %s177_s1 = sshll.u32 %s353_s0, 4  ;;  %s354_s24 = smov 64   ;;  %s178_s1 = int_to_ptr.vmem [resolvable:$true] %s177_s1 }
   0xe   :  { %v90_v5 = vpack.c.bf16 %v81_v4, %v80_v2  ;;  %v79_v7 = vld [vmem:[#allocation5 + $0x58] sm:$0xff]  ;;  %v76_v9 = vld [vmem:[#allocation5 + $0x40] sm:$0xff]  ;;  %v77_v10 = vld [vmem:[#allocation5 + $0x48] sm:$0xff]  ;;  %s355_s25 = smov 4  }
   0xf   :  { %92 = vmatpush.bf16.msra.mxu0 %v91_v3  ;;  %240 = vmatpush.bf16.msra.mxu1 %v91_v3  ;;  %v89_v8 = vpack.c.bf16 %v79_v7, %v78_v6  ;;  %v88_v11 = vpack.c.bf16 %v77_v10, %v76_v9  ;;  %v74_v12 = vld [vmem:[#allocation5 + $0x30] sm:$0xff]  ;;  %v75_v13 = vld [vmem:[#allocation5 + $0x38] sm:$0xff]  ;;  %v72_v15 = vld [vmem:[#allocation5 + $0x20] sm:$0xff] }
  0x10   :  { %241 = vmatpush.bf16.msra.mxu2 %v91_v3  ;;  %242 = vmatpush.bf16.msra.mxu3 %v91_v3  ;;  %v87_v14 = vpack.c.bf16 %v75_v13, %v74_v12  ;;  %v73_v16 = vld [vmem:[#allocation5 + $0x28] sm:$0xff]  ;;  %v70_v18 = vld [vmem:[#allocation5 + $0x10] sm:$0xff]  ;;  %v71_v19 = vld [vmem:[#allocation5 + $0x18] sm:$0xff] }
  0x11   :  { %v86_v17 = vpack.c.bf16 %v73_v16, %v72_v15  ;;  %v85_v20 = vpack.c.bf16 %v71_v19, %v70_v18  ;;  %v68_v21 = vld [vmem:[#allocation5] sm:$0xff]  ;;  %v69_v22 = vld [vmem:[#allocation5 + $0x8] sm:$0xff]  ;;  %v46_v36 = vld [vmem:[#allocation2 + $0x10] sm:$0xff] }
  0x12   :  { %v44_v23 = vld [vmem:[#allocation2] sm:$0xff]  ;;  %v45_v24 = vld [vmem:[#allocation2 + $0x8] sm:$0xff]  ;;  %v84_v25 = vpack.c.bf16 %v69_v22, %v68_v21  ;;  %v47_v37 = vld [vmem:[#allocation2 + $0x18] sm:$0xff] }
  0x13   :  { %93 = vmatpush.bf16.msra.mxu0 %v90_v5  ;;  %243 = vmatpush.bf16.msra.mxu1 %v90_v5  ;;  %v48_v26 = vld [vmem:[#allocation2 + $0x20] sm:$0xff]  ;;  %v49_v27 = vld [vmem:[#allocation2 + $0x28] sm:$0xff]  ;;  %v60_v32 = vpack.c.bf16 %v45_v24, %v44_v23  ;;  %v50_v38 = vld [vmem:[#allocation2 + $0x30] sm:$0xff]  ;;  %v61_v44 = vpack.c.bf16 %v47_v37, %v46_v36 }
  0x14   :  { %244 = vmatpush.bf16.msra.mxu2 %v90_v5  ;;  %245 = vmatpush.bf16.msra.mxu3 %v90_v5  ;;  %v52_v28 = vld [vmem:[#allocation2 + $0x40] sm:$0xff]  ;;  %v53_v29 = vld [vmem:[#allocation2 + $0x48] sm:$0xff]  ;;  %v62_v33 = vpack.c.bf16 %v49_v27, %v48_v26  ;;  %v51_v39 = vld [vmem:[#allocation2 + $0x38] sm:$0xff] }
  0x15   :  { %v56_v30 = vld [vmem:[#allocation2 + $0x60] sm:$0xff]  ;;  %v57_v31 = vld [vmem:[#allocation2 + $0x68] sm:$0xff]  ;;  %v64_v34 = vpack.c.bf16 %v53_v29, %v52_v28  ;;  %v54_v40 = vld [vmem:[#allocation2 + $0x50] sm:$0xff]  ;;  %v63_v45 = vpack.c.bf16 %v51_v39, %v50_v38 }
  0x16   :  { %v66_v35 = vpack.c.bf16 %v57_v31, %v56_v30  ;;  %v55_v41 = vld [vmem:[#allocation2 + $0x58] sm:$0xff]  ;;  %v58_v42 = vld [vmem:[#allocation2 + $0x70] sm:$0xff] }
  0x17   :  { %94 = vmatpush.bf16.msra.mxu0 %v89_v8  ;;  %246 = vmatpush.bf16.msra.mxu1 %v89_v8  ;;  %v59_v43 = vld [vmem:[#allocation2 + $0x78] sm:$0xff]  ;;  %v65_v46 = vpack.c.bf16 %v55_v41, %v54_v40 }
  0x18   :  { %247 = vmatpush.bf16.msra.mxu2 %v89_v8  ;;  %248 = vmatpush.bf16.msra.mxu3 %v89_v8  ;;  %v67_v47 = vpack.c.bf16 %v59_v43, %v58_v42 }
  0x1b   :  { %95 = vmatpush.bf16.msra.mxu0 %v88_v11  ;;  %249 = vmatpush.bf16.msra.mxu1 %v88_v11 }
  0x1c   :  { %250 = vmatpush.bf16.msra.mxu2 %v88_v11  ;;  %251 = vmatpush.bf16.msra.mxu3 %v88_v11 }
  0x1f   :  { %96 = vmatpush.bf16.msra.mxu0 %v87_v14  ;;  %252 = vmatpush.bf16.msra.mxu1 %v87_v14 }
  0x20   :  { %253 = vmatpush.bf16.msra.mxu2 %v87_v14  ;;  %254 = vmatpush.bf16.msra.mxu3 %v87_v14 }
  0x23   :  { %97 = vmatpush.bf16.msra.mxu0 %v86_v17  ;;  %255 = vmatpush.bf16.msra.mxu1 %v86_v17 }
  0x24   :  { %256 = vmatpush.bf16.msra.mxu2 %v86_v17  ;;  %257 = vmatpush.bf16.msra.mxu3 %v86_v17 }
  0x27   :  { %98 = vmatpush.bf16.msra.mxu0 %v85_v20  ;;  %258 = vmatpush.bf16.msra.mxu1 %v85_v20 }
  0x28   :  { %259 = vmatpush.bf16.msra.mxu2 %v85_v20  ;;  %260 = vmatpush.bf16.msra.mxu3 %v85_v20 }
  0x2b   :  { %99 = vmatpush.bf16.msra.mxu0 %v84_v25  ;;  %261 = vmatpush.bf16.msra.mxu1 %v84_v25 }
  0x2c   :  { %262 = vmatpush.bf16.msra.mxu2 %v84_v25  ;;  %263 = vmatpush.bf16.msra.mxu3 %v84_v25 }
  0x2e   :  { %100 = vmatmul.bf16.vlgmr.msra.gmra.mxu0 %v60_v32  ;;  %110 = vmatmul.bf16.vlgmr.msra.gmra.mxu1 %v62_v33 }
  0x2f   :  { %120 = vmatmul.bf16.vlgmr.msra.gmra.mxu2 %v64_v34  ;;  %130 = vmatmul.bf16.vlgmr.msra.gmra.mxu3 %v66_v35 }
  0x3e   :  { %105 = vmatmul.bf16.gmra.mxu0 %v61_v44  ;;  %115 = vmatmul.bf16.gmra.mxu1 %v63_v45 }
  0x3f   :  { %125 = vmatmul.bf16.gmra.mxu2 %v65_v46  ;;  %135 = vmatmul.bf16.gmra.mxu3 %v67_v47 }
  0xab   :  { %v101_v48 = vpop.f32.mrf.mxu0  ;;  %v111_v49 = vpop.f32.mrf.mxu1 }
  0xb2   :  { %v121_v50 = vpop.f32.mrf.mxu2  ;;  %v131_v51 = vpop.f32.mrf.mxu3 }
  0xb3   :  { %v103_v52 = vpop.f32.mrf.mxu0  ;;  %v113_v53 = vpop.f32.mrf.mxu1 }
  0xb4   :  { %v196_v54 = vpack.c.bf16 %v103_v52, %v101_v48  ;;  %v206_v55 = vpack.c.bf16 %v113_v53, %v111_v49 }
  0xb6   :  { %197 = vst [vmem:[#allocation7] sm:$0xff] %v196_v54  }
  0xb7   :  { %234 = vst [vmem:[#allocation7 + $0x10] sm:$0xff] %v206_v55  }
  0xba   :  { %v123_v56 = vpop.f32.mrf.mxu2  ;;  %v133_v57 = vpop.f32.mrf.mxu3 }
  0xbb   :  { %v216_v58 = vpack.c.bf16 %v123_v56, %v121_v50  ;;  %v226_v59 = vpack.c.bf16 %v133_v57, %v131_v51  ;;  %v106_v60 = vpop.f32.mrf.mxu0  ;;  %v116_v61 = vpop.f32.mrf.mxu1 }
  0xbd   :  { %236 = vst [vmem:[#allocation7 + $0x20] sm:$0xff] %v216_v58  }
  0xbe   :  { %238 = vst [vmem:[#allocation7 + $0x30] sm:$0xff] %v226_v59  }
  0xc2   :  { %v126_v62 = vpop.f32.mrf.mxu2  ;;  %v136_v63 = vpop.f32.mrf.mxu3 }
  0xc3   :  { %v108_v0 = vpop.f32.mrf.mxu0  ;;  %v118_v1 = vpop.f32.mrf.mxu1 }
  0xc4   :  { %v201_v2 = vpack.c.bf16 %v108_v0, %v106_v60  ;;  %v211_v3 = vpack.c.bf16 %v118_v1, %v116_v61 }
  0xc6   :  { %233 = vst [vmem:[#allocation7 + $0x8] sm:$0xff] %v201_v2  }
  0xc7   :  { %235 = vst [vmem:[#allocation7 + $0x18] sm:$0xff] %v211_v3  }
  0xca   :  { %v128_v4 = vpop.f32.mrf.mxu2  ;;  %v138_v5 = vpop.f32.mrf.mxu3 }
  0xcb   :  { %v221_v6 = vpack.c.bf16 %v128_v4, %v126_v62  ;;  %v231_v7 = vpack.c.bf16 %v138_v5, %v136_v63 }
  0xcd   :  { %237 = vst [vmem:[#allocation7 + $0x28] sm:$0xff] %v221_v6  }
  0xce   :  { %239 = vst [vmem:[#allocation7 + $0x38] sm:$0xff] %v231_v7  }
  0xcf   :  { %185 = dma.vmem_to_hbm [thread:$0]  %s178_s1, 1024, %s180_s23, [#allocation4], %s354_s24, %s354_s24, %s355_s25  }
  0xd0   :  { %347 = dma.done.wait [#allocation4], 1024  }
  0xd1   :  { %348 = vsyncadd [#allocation4], 4294966272 }
  0xd2   :  { %190 = vsyncpa [#allocation3], 1 }
  0xd3   :  { %191 = vsyncpa [#allocation6], 1 }
  0xd4   :  { %192 = vsyncpa [#allocation4], 1 }

</bundles_post_ra>
